<compile_context>
chip_gen: v5e
topology: v5e:2x2
jax: 0.10.0
libtpu: 0.0.40
codegen_flags: <defaults>
</compile_context>

<pallas_src>
import functools

import jax
import jax.numpy as jnp
from jax.experimental import pallas as pl
from jax.experimental.pallas import tpu as pltpu  # noqa: F401  (TPU backend)

ROWS = 8     # sublane-aligned slab height (supports n <= 8)
LANES = 128  # lane-dense slab width for the right-hand operands


def _chained_mm_kernel(n, ops_ref, o_ref):
    # ops_ref: (4, ROWS, LANES) zero-padded operands [input1, input2, input3, input4]
    # Real data lives in ops_ref[:, :n, :n]; padding is exactly zero, so every
    # intermediate (t1, t2, res1, out) is zero outside its top-left (n, n)
    # block and contractions only need the first ROWS columns of the left
    # operand.
    a = ops_ref[0, :, :ROWS]      # (8, 8)   left operand of t1 (Ref slice: view, no full load)
    b = ops_ref[1]                # (8, 128) right operand of t1
    c = ops_ref[2, :, :ROWS]      # (8, 8)   left operand of t2
    d = ops_ref[3]                # (8, 128) right operand of t2

    hi = jax.lax.Precision.HIGHEST
    t1 = jnp.dot(a, b, preferred_element_type=jnp.float32, precision=hi)   # (8, 128)
    t2 = jnp.dot(c, d, preferred_element_type=jnp.float32, precision=hi)   # (8, 128)
    res1 = t1 + t2                                                         # (8, 128)
    out = jnp.dot(res1[:, :ROWS], t2,                                      # (8, 128)
                  preferred_element_type=jnp.float32, precision=hi)

    o_ref[...] = out[:n, :n]      # masked store of the (n, n) result


@jax.jit
def model_forward(input1, input2, input3, input4):
    """JAX/Pallas equivalent of Model.forward for square (n, n) f32 inputs, n <= 8."""
    n = input1.shape[0]
    assert n <= ROWS, f"kernel supports n <= {ROWS}, got n = {n}"

    # Stack + single fused zero-pad into one contiguous (4, ROWS, LANES) slab (16 KiB).
    stacked = jnp.stack([input1, input2, input3, input4], axis=0).astype(jnp.float32)
    ops = jnp.zeros((4, ROWS, LANES), dtype=jnp.float32).at[:, :n, :n].set(stacked)

    flops = 2 * 3 * (ROWS * ROWS * LANES)              # three (8,8,128) matmuls
    bytes_accessed = 4 * ROWS * LANES * 4 + n * n * 4  # input slab + (n,n) output

    return pl.pallas_call(
        functools.partial(_chained_mm_kernel, n),
        out_shape=jax.ShapeDtypeStruct((n, n), jnp.float32),
        in_specs=[pl.BlockSpec((4, ROWS, LANES), lambda: (0, 0, 0))],
        out_specs=pl.BlockSpec((n, n), lambda: (0, 0)),
        cost_estimate=pl.CostEstimate(
            flops=flops, transcendentals=0, bytes_accessed=bytes_accessed
        ),
    )(ops)


if __name__ == "__main__":
    key = jax.random.PRNGKey(0)
    k1, k2, k3, k4 = jax.random.split(key, 4)
    input1 = jax.random.normal(k1, (3, 3), dtype=jnp.float32)
    input2 = jax.random.normal(k2, (3, 3), dtype=jnp.float32)
    input3 = jax.random.normal(k3, (3, 3), dtype=jnp.float32)
    input4 = jax.random.normal(k4, (3, 3), dtype=jnp.float32)

    out = model_forward(input1, input2, input3, input4)
    jax.block_until_ready(out)

    # Pure-JAX reference check
    t1 = input1 @ input2
    t2 = input3 @ input4
    ref = (t1 + t2) @ t2
    assert out.shape == (3, 3)
    assert jnp.allclose(out, ref, atol=1e-4, rtol=1e-4), (out, ref)

    print("KERNEL_OK")
</pallas_src>

<mosaic_0001>
module attributes {stable_mosaic.version = 11 : i64} {
  func.func @_chained_mm_kernel(%arg0: memref<4x8x128xf32, #tpu.memory_space<vmem>>, %arg1: memref<3x3xf32, #tpu.memory_space<vmem>>) attributes {dimension_semantics = [], scalar_prefetch = 0 : i64, scratch_operands = 0 : i64, tpu.core_type = #tpu.core_type<tc>} {
    %c0 = arith.constant 0 : index
    %c0_0 = arith.constant 0 : index
    %c0_1 = arith.constant 0 : index
    %0 = vector.load %arg0[%c0, %c0_0, %c0_1] : memref<4x8x128xf32, #tpu.memory_space<vmem>>, vector<1x8x8xf32>
    %1 = vector.shape_cast %0 : vector<1x8x8xf32> to vector<8x8xf32>
    %c1 = arith.constant 1 : index
    %c0_2 = arith.constant 0 : index
    %c0_3 = arith.constant 0 : index
    %2 = vector.load %arg0[%c1, %c0_2, %c0_3] : memref<4x8x128xf32, #tpu.memory_space<vmem>>, vector<1x8x128xf32>
    %3 = vector.shape_cast %2 : vector<1x8x128xf32> to vector<8x128xf32>
    %c2 = arith.constant 2 : index
    %c0_4 = arith.constant 0 : index
    %c0_5 = arith.constant 0 : index
    %4 = vector.load %arg0[%c2, %c0_4, %c0_5] : memref<4x8x128xf32, #tpu.memory_space<vmem>>, vector<1x8x8xf32>
    %5 = vector.shape_cast %4 : vector<1x8x8xf32> to vector<8x8xf32>
    %c3 = arith.constant 3 : index
    %c0_6 = arith.constant 0 : index
    %c0_7 = arith.constant 0 : index
    %6 = vector.load %arg0[%c3, %c0_6, %c0_7] : memref<4x8x128xf32, #tpu.memory_space<vmem>>, vector<1x8x128xf32>
    %7 = vector.shape_cast %6 : vector<1x8x128xf32> to vector<8x128xf32>
    %cst = arith.constant dense<0.000000e+00> : vector<8x128xf32>
    %8 = tpu.matmul %1, %3, %cst {dimension_numbers = #tpu.dot_dimension_numbers<[1], [0], [0], [1], [0, 0, 1, 1], [], []>, precision = #tpu.contract_precision<fp32>} : vector<8x8xf32>, vector<8x128xf32>, vector<8x128xf32> -> vector<8x128xf32>
    %cst_8 = arith.constant dense<0.000000e+00> : vector<8x128xf32>
    %9 = tpu.matmul %5, %7, %cst_8 {dimension_numbers = #tpu.dot_dimension_numbers<[1], [0], [0], [1], [0, 0, 1, 1], [], []>, precision = #tpu.contract_precision<fp32>} : vector<8x8xf32>, vector<8x128xf32>, vector<8x128xf32> -> vector<8x128xf32>
    %10 = arith.addf %8, %9 : vector<8x128xf32>
    %11 = vector.extract_strided_slice %10 {offsets = [0, 0], sizes = [8, 8], strides = [1, 1]} : vector<8x128xf32> to vector<8x8xf32>
    %cst_9 = arith.constant dense<0.000000e+00> : vector<8x128xf32>
    %12 = tpu.matmul %11, %9, %cst_9 {dimension_numbers = #tpu.dot_dimension_numbers<[1], [0], [0], [1], [0, 0, 1, 1], [], []>, precision = #tpu.contract_precision<fp32>} : vector<8x8xf32>, vector<8x128xf32>, vector<8x128xf32> -> vector<8x128xf32>
    %13 = vector.extract_strided_slice %12 {offsets = [0, 0], sizes = [3, 3], strides = [1, 1]} : vector<8x128xf32> to vector<3x3xf32>
    %c0_10 = arith.constant 0 : index
    %c0_11 = arith.constant 0 : index
    %14 = vector.load %arg1[%c0_10, %c0_11] : memref<3x3xf32, #tpu.memory_space<vmem>>, vector<3x3xf32>
    tpu.vector_store %arg1[%c0_10, %c0_11], %13 {strides = array<i32>} : memref<3x3xf32, #tpu.memory_space<vmem>>, vector<3x3xf32>,
    return
  }
}

</mosaic_0001>

<bundles_post_ra>
// kernel: model_forward.1
= control target key start
LH: loop header
LB: loop body
LE: loop exit
PB: predicated region body
PF: predicated region fallthrough
CT: control target
= control target key end

     0   :  { %vm16_vm0 = vcmask 64512   ;;  %s541_s0 = inlined_call_operand.vmem [shape: f32[4,8,128], index: 0, kind: input, shape index: {}]   ;;  %s542_s1 = inlined_call_operand.hbm [shape: f32[3,3], index: 1, kind: output, shape index: {}]  }
   0x1   :  { %v484_v0 = vld [vmem:[%s541_s0 + $0x18] sm:$0xff]  ;;  %v9_v1 = vld [vmem:[%s541_s0] sm:$0xff]  ;;  %v483_v2 = vld [vmem:[%s541_s0 + $0x10] sm:$0xff] }
   0x2   :  { %v35_v3 = vand.u32 4294901760, %v484_v0  ;;  %v18_v4 = vsel %vm16_vm0, %v483_v2, 0  ;;  %v167_v5 = vsel %vm16_vm0, %v9_v1, 0  ;;  %v482_v6 = vld [vmem:[%s541_s0 + $0x8] sm:$0xff] }
   0x3   :  { %6 = vsyncpa [#allocation3], 0  ;;  %v37_v7 = vand.u32 4294901760, %v18_v4  ;;  %v186_v8 = vand.u32 4294901760, %v167_v5  ;;  %v184_v9 = vand.u32 4294901760, %v482_v6  ;;  %s512_s0 = smov [#allocation2]  }
   0x4   :  { %v62_v10 = vsub.f32 %v484_v0, %v35_v3  ;;  %112 = vmatpush.msra.mxu3 %v35_v3  ;;  %36 = vmatpush.msra.mxu0 %v35_v3  ;;  %s471_s14 = sshll.u32 %s512_s0, 4  ;;  %s473_s17 = sshll.u32 %s542_s1, 4  ;;  %vm464_vm1 = vcmask 18432   ;;  %s472_s14 = int_to_ptr.vmem [resolvable:$true] %s471_s14  ;;  %s474_s17 = int_to_ptr.hbm [resolvable:$true] %s473_s17 }
   0x5   :  { %v38_v11 = vsub.f32 %v18_v4, %v37_v7  ;;  %v211_v12 = vsub.f32 %v482_v6, %v184_v9  ;;  %v187_v13 = vsub.f32 %v167_v5, %v186_v8 }
   0x6   :  { %89 = vmatpush.msra.mxu2 %v62_v10  ;;  %v63_v14 = vand.u32 4294901760, %v62_v10 }
   0x7   :  { %92 = vmatmul.f32.vlgmr.msra.gmra.mxu2 %v38_v11  ;;  %v39_v15 = vand.u32 4294901760, %v38_v11  ;;  %v212_v16 = vand.u32 4294901760, %v211_v12  ;;  %v188_v17 = vand.u32 4294901760, %v187_v13 }
   0x8   :  { %185 = vmatpush.msrb.mxu2 %v184_v9  ;;  %v64_v18 = vsub.f32 %v62_v10, %v63_v14  ;;  %138 = vmatpush.msrb.mxu0 %v63_v14 }
   0x9   :  { %116 = vmatmul.f32.vlgmr.msra.gmra.mxu3 %v39_v15  ;;  %v40_v19 = vsub.f32 %v38_v11, %v39_v15  ;;  %v213_v20 = vsub.f32 %v211_v12, %v212_v16  ;;  %v189_v21 = vsub.f32 %v187_v13, %v188_v17 }
   0xa   :  { %287 = vmatpush.msra.mxu2 %v212_v16  ;;  %v65_v22 = vand.u32 4294901760, %v64_v18 }
   0xb   :  { %v41_v23 = vand.u32 4294901760, %v40_v19  ;;  %v214_v24 = vand.u32 4294901760, %v213_v20  ;;  %v190_v25 = vand.u32 4294901760, %v189_v21 }
   0xc   :  { %66 = vmatpush.msra.mxu1 %v65_v22 }
   0xd   :  { %42 = vmatmul.f32.vlgmr.msra.gmra.mxu0 %v41_v23  ;;  %68 = vmatmul.f32.vlgmr.msra.gmra.mxu1 %v37_v7 }
   0xe   :  { %215 = vmatpush.msrb.mxu3 %v214_v24  ;;  %160 = vmatpush.msrb.mxu1 %v35_v3 }
   0xf   :  { %191 = vmatmul.f32.vlgmr.msrb.gmra.mxu2 %v190_v25  ;;  %238 = vmatpush.msra.mxu0 %v211_v12 }
  0x10   :  { %309 = vmatpush.msra.mxu3 %v184_v9  ;;  %261 = vmatpush.msra.mxu1 %v184_v9 }
  0x11   :  { %217 = vmatmul.f32.vlgmr.msrb.gmra.mxu3 %v186_v8 }
  0x15   :  { %140 = vmatmul.f32.vlgmr.msrb.gmra.mxu0 %v37_v7  ;;  %162 = vmatmul.f32.vlgmr.msrb.gmra.mxu1 %v37_v7 }
  0x17   :  { %289 = vmatmul.f32.vlgmr.msra.gmra.mxu2 %v186_v8 }
  0x19   :  { %311 = vmatmul.f32.vlgmr.msra.gmra.mxu3 %v186_v8 }
  0x1d   :  { %241 = vmatmul.f32.vlgmr.msra.gmra.mxu0 %v187_v13  ;;  %265 = vmatmul.f32.vlgmr.msra.gmra.mxu1 %v188_v17 }
  0x8a   :  { %v43_v26 = vpop.f32.mrf.mxu0  ;;  %v69_v27 = vpop.f32.mrf.mxu1 }
  0x8b   :  { %v70_v28 = vadd.f32 %v69_v27, %v43_v26  ;;  %v93_v29 = vpop.f32.mrf.mxu2 }
  0x8c   :  { %v117_v30 = vpop.f32.mrf.mxu3 }
  0x8d   :  { %v94_v31 = vadd.f32 %v93_v29, %v70_v28 }
  0x8f   :  { %v118_v32 = vadd.f32 %v117_v30, %v94_v31 }
  0x92   :  { %v141_v33 = vpop.f32.mrf.mxu0  ;;  %v163_v34 = vpop.f32.mrf.mxu1 }
  0x93   :  { %v142_v35 = vadd.f32 %v141_v33, %v118_v32  ;;  %v192_v36 = vpop.f32.mrf.mxu2 }
  0x94   :  { %v218_v37 = vpop.f32.mrf.mxu3 }
  0x95   :  { %v164_v38 = vadd.f32 %v163_v34, %v142_v35 }
  0x97   :  { %v333_v39 = vand.u32 4294901760, %v164_v38  ;;  %v193_v40 = vadd.f32 %v192_v36, %v164_v38 }
  0x99   :  { %v360_v41 = vsub.f32 %v164_v38, %v333_v39  ;;  %v219_v42 = vadd.f32 %v218_v37, %v193_v40  ;;  %334 = vmatpush.msrb.mxu0 %v333_v39  ;;  %410 = vmatpush.msrb.mxu3 %v333_v39 }
  0x9a   :  { %v242_v43 = vpop.f32.mrf.mxu0  ;;  %v266_v44 = vpop.f32.mrf.mxu1 }
  0x9b   :  { %v243_v45 = vadd.f32 %v242_v43, %v219_v42  ;;  %387 = vmatpush.msrb.mxu2 %v360_v41  ;;  %v361_v46 = vand.u32 4294901760, %v360_v41  ;;  %v290_v47 = vpop.f32.mrf.mxu2 }
  0x9c   :  { %v312_v50 = vpop.f32.mrf.mxu3 }
  0x9d   :  { %v267_v48 = vadd.f32 %v266_v44, %v243_v45  ;;  %436 = vmatpush.msra.mxu0 %v361_v46  ;;  %v362_v49 = vsub.f32 %v360_v41, %v361_v46 }
  0x9f   :  { %v291_v51 = vadd.f32 %v290_v47, %v267_v48  ;;  %v363_v52 = vand.u32 4294901760, %v362_v49 }
  0xa1   :  { %v313_v53 = vadd.f32 %v312_v50, %v291_v51  ;;  %364 = vmatpush.msrb.mxu1 %v363_v52 }
  0xa3   :  { %458 = vmatpush.msra.mxu1 %v333_v39  ;;  %v316_v54 = vsel %vm16_vm0, %v313_v53, 0 }
  0xa4   :  { %v335_v55 = vand.u32 4294901760, %v316_v54 }
  0xa6   :  { %v336_v56 = vsub.f32 %v316_v54, %v335_v55  ;;  %366 = vmatmul.f32.vlgmr.msrb.gmra.mxu1 %v335_v55 }
  0xa8   :  { %390 = vmatmul.f32.vlgmr.msrb.gmra.mxu2 %v336_v56  ;;  %v337_v57 = vand.u32 4294901760, %v336_v56 }
  0xaa   :  { %414 = vmatmul.f32.vlgmr.msrb.gmra.mxu3 %v337_v57  ;;  %v338_v58 = vsub.f32 %v336_v56, %v337_v57 }
  0xac   :  { %v339_v59 = vand.u32 4294901760, %v338_v58 }
  0xae   :  { %340 = vmatmul.f32.vlgmr.msrb.gmra.mxu0 %v339_v59  ;;  %460 = vmatmul.f32.vlgmr.msra.gmra.mxu1 %v335_v55 }
  0xb6   :  { %438 = vmatmul.f32.vlgmr.msra.gmra.mxu0 %v335_v55 }
 0x123   :  { %v367_v60 = vpop.f32.mrf.mxu1 }
 0x12b   :  { %v341_v61 = vpop.f32.mrf.mxu0  ;;  %v391_v63 = vpop.f32.mrf.mxu2 }
 0x12c   :  { %v368_v62 = vadd.f32 %v367_v60, %v341_v61  ;;  %v461_v5 = vpop.f32.mrf.mxu1 }
 0x12d   :  { %v415_v1 = vpop.f32.mrf.mxu3 }
 0x12e   :  { %v392_v0 = vadd.f32 %v391_v63, %v368_v62 }
 0x130   :  { %v416_v2 = vadd.f32 %v415_v1, %v392_v0 }
 0x133   :  { %v439_v3 = vpop.f32.mrf.mxu0 }
 0x134   :  { %v440_v4 = vadd.f32 %v439_v3, %v416_v2 }
 0x136   :  { %v462_v6 = vadd.f32 %v461_v5, %v440_v4 }
 0x138   :  { %465 = vst.msk [vmem:[#allocation2] sm:$0x7] %vm464_vm1, %v462_v6 }
 0x139   :  { %476 = dma.vmem_to_hbm [thread:$0]  %s472_s14, 64, %s474_s17, [#allocation3]  }
 0x13a   :  { %510 = dma.done.wait [#allocation3], 64  }
 0x13b   :  { %511 = vsyncadd [#allocation3], 4294967232 }
 0x13c   :  { %481 = vsyncpa [#allocation3], 1 }

</bundles_post_ra>
